<compile_context>
chip_gen: v7x
topology: tpu7x:2x2x1
jax: 0.10.0
libtpu: 0.0.40
codegen_flags: <defaults>
</compile_context>

<pallas_src>
import functools

import jax
import jax.numpy as jnp
from jax.experimental import pallas as pl
from jax.experimental.pallas import tpu as pltpu


def _round_up(x, m):
    return (x + m - 1) // m * m


# Conservative per-step VMEM budget that works across v5e (16 MiB default
# scoped limit, raised below), v6e (32/128 MiB) and v7x (64 MiB per TC).
_VMEM_BUDGET = 48 << 20


def _mlp_kernel(x_ref, w1_ref, b1_ref, w2_ref, b2_ref, o_ref):
    # Cast activations to the MXU compute dtype in VMEM (no extra HBM traffic).
    x = x_ref[...].astype(w1_ref.dtype)
    # Hidden layer: bf16 x @ bf16 W1 on the MXU, f32 accumulation.
    h = jnp.dot(x, w1_ref[...], preferred_element_type=jnp.float32)
    h = jnp.maximum(h + b1_ref[...], 0.0)            # f32 bias add + ReLU (VPU)
    # Output layer: hidden truncated to bf16 (conscious choice) -> MXU, f32 acc.
    out = jnp.dot(h.astype(w2_ref.dtype), w2_ref[...],
                  preferred_element_type=jnp.float32)
    o_ref[...] = (out + b2_ref[...]).astype(o_ref.dtype)


def prepare_simple_network_params(w1, b1, w2, b2, compute_dtype=jnp.bfloat16):
    """One-time weight preparation (hoisted out of the per-forward path).

    Pads the hidden dim to a multiple of 128 lanes and casts weights to the
    MXU compute dtype. Zero padding is exact: padded hidden units get
    ReLU(0 + 0) = 0 and multiply zero rows of the padded W2. Call this once
    (at init / after each optimizer step) and reuse the result across calls.
    """
    input_dim, fc1_dim = w1.shape
    n_action = w2.shape[1]
    fc1_p = _round_up(fc1_dim, 128)

    w1p = jnp.zeros((input_dim, fc1_p), compute_dtype).at[:, :fc1_dim].set(
        w1.astype(compute_dtype))
    b1p = jnp.zeros((1, fc1_p), jnp.float32).at[:, :fc1_dim].set(
        b1.reshape(1, -1).astype(jnp.float32))
    w2p = jnp.zeros((fc1_p, n_action), compute_dtype).at[:fc1_dim, :].set(
        w2.astype(compute_dtype))
    b2p = b2.reshape(1, -1).astype(jnp.float32)
    return w1p, b1p, w2p, b2p


@functools.partial(jax.jit, static_argnames=("block_b",))
def simple_network_forward(x, w1p, b1p, w2p, b2p, *, block_b=512):
    """Fused forward: Linear(input_dim, fc1) -> ReLU -> Linear(fc1, n_action).

    Takes weights already prepared by `prepare_simple_network_params`.
    """
    B, input_dim = x.shape
    assert w1p.shape[0] == input_dim, "x feature dim must match prepared W1"
    fc1_p = w1p.shape[1]
    act_out = w2p.shape[1]                 # true n_action (unpadded output dim)

    # Sublane-align the batch only (pads at most 7 rows, numerically irrelevant:
    # padded rows are sliced off before returning).
    B_p = max(_round_up(B, 8), 8)
    if B_p != B:
        x = jnp.pad(x, ((0, B_p - B), (0, 0)))

    w_bytes = ((w1p.size + w2p.size) * jnp.dtype(w1p.dtype).itemsize
               + (b1p.size + b2p.size) * 4)

    def _vmem_footprint(b):
        return (2 * b * input_dim * x.dtype.itemsize   # x tiles (double-buffered)
                + 2 * b * act_out * 4                  # f32 out tiles (double-buffered)
                + 2 * w_bytes                          # weights/biases (double-buffered)
                + b * fc1_p * 4)                       # f32 hidden intermediate

    # --- batch tile selection ---
    if B_p <= 128:
        blk = B_p                                      # single small block
    else:
        blk = _round_up(min(block_b, B_p), 128)
        # Guarantee >= 2 grid steps so the "parallel" axis shards across v7x's
        # two TensorCores; costs only ~0.35 us extra step overhead elsewhere.
        blk = min(blk, max(_round_up(pl.cdiv(B_p, 2), 128), 128))
        # Shrink the tile if the per-step footprint would blow the VMEM budget.
        while blk > 128 and _vmem_footprint(blk) > _VMEM_BUDGET:
            blk = max(_round_up(blk // 2, 128), 128)

    grid = (pl.cdiv(B_p, blk),)            # partial last block handled by Pallas
    vmem_limit = int(min(max(2 * _vmem_footprint(blk), 32 << 20), 64 << 20))

    cost = pl.CostEstimate(
        flops=2 * B_p * (input_dim * fc1_p + fc1_p * act_out),
        transcendentals=0,
        bytes_accessed=(B_p * input_dim * x.dtype.itemsize   # x (streamed once)
                        + B_p * act_out * 4                  # f32 output
                        + w_bytes),                          # weights DMA'd once
    )

    out = pl.pallas_call(
        _mlp_kernel,
        out_shape=jax.ShapeDtypeStruct((B_p, act_out), jnp.float32),
        grid_spec=pltpu.PrefetchScalarGridSpec(
            num_scalar_prefetch=0,
            grid=grid,
            in_specs=[
                # Batch-tiled activations; last dim equals the full array dim,
                # so no feature padding is needed (Mosaic lane-pads internally).
                pl.BlockSpec((blk, input_dim), lambda i: (i, 0)),
                # Weights / biases: constant index_map -> DMA'd once, VMEM-resident.
                pl.BlockSpec((input_dim, fc1_p), lambda i: (0, 0)),
                pl.BlockSpec((1, fc1_p), lambda i: (0, 0)),
                pl.BlockSpec((fc1_p, act_out), lambda i: (0, 0)),
                pl.BlockSpec((1, act_out), lambda i: (0, 0)),
            ],
            # Output unpadded in the action dim: avoids f32 writeback of padded
            # lanes (was the largest HBM stream at small n_action).
            out_specs=pl.BlockSpec((blk, act_out), lambda i: (i, 0)),
        ),
        compiler_params=pltpu.CompilerParams(
            dimension_semantics=("parallel",),   # batch tiles shard across v7x TCs
            vmem_limit_bytes=vmem_limit,
        ),
        cost_estimate=cost,
    )(x, w1p, b1p, w2p, b2p)

    return out[:B] if B_p != B else out


def init_simple_network_params(key, input_dim, fc1_dim, n_action):
    """Deterministic init mimicking PyTorch nn.Linear defaults:
    U(-1/sqrt(fan_in), 1/sqrt(fan_in)) for both weight and bias."""
    k1, k2, k3, k4 = jax.random.split(key, 4)
    bound1 = 1.0 / jnp.sqrt(jnp.float32(input_dim))
    bound2 = 1.0 / jnp.sqrt(jnp.float32(fc1_dim))
    # stored as (in, out) — see layout comment at top
    w1 = jax.random.uniform(k1, (input_dim, fc1_dim), jnp.float32, -bound1, bound1)
    b1 = jax.random.uniform(k2, (fc1_dim,), jnp.float32, -bound1, bound1)
    w2 = jax.random.uniform(k3, (fc1_dim, n_action), jnp.float32, -bound2, bound2)
    b2 = jax.random.uniform(k4, (n_action,), jnp.float32, -bound2, bound2)
    return w1, b1, w2, b2


def _reference(x, w1, b1, w2, b2):
    """Plain-JAX reference mirroring the kernel's bf16-operand / f32-accumulate math."""
    xb = x.astype(jnp.bfloat16).astype(jnp.float32)
    w1b = w1.astype(jnp.bfloat16).astype(jnp.float32)
    w2b = w2.astype(jnp.bfloat16).astype(jnp.float32)
    h = jnp.maximum(xb @ w1b + b1.reshape(1, -1), 0.0)
    return h.astype(jnp.bfloat16).astype(jnp.float32) @ w2b + b2.reshape(1, -1)


if __name__ == "__main__":
    # Small shapes consistent with the module's forward: SimpleNetwork only uses
    # Linear(input_dim -> fc1_dim) -> ReLU -> Linear(fc1_dim -> n_action).
    # TODO(synk): optimizer (Adam), loss and lr (and the unused fc2/fc3/fc4 ctor
    # args) are training-time members, not part of the forward pass.
    input_dim, fc1_dim, n_action = 32, 64, 16

    key = jax.random.PRNGKey(0)
    k_x, k_x2, k_p = jax.random.split(key, 3)
    w1, b1, w2, b2 = init_simple_network_params(k_p, input_dim, fc1_dim, n_action)

    # Hoisted one-time weight preparation (pad hidden dim + cast to bf16).
    params = prepare_simple_network_params(w1, b1, w2, b2)
    params = tuple(jax.block_until_ready(p) for p in params)

    # Case 1: small batch (single block, block == full padded batch).
    x = jax.random.normal(k_x, (8, input_dim), dtype=jnp.float32)
    actions = jax.block_until_ready(simple_network_forward(x, *params))
    ref = _reference(x, w1, b1, w2, b2)
    assert actions.shape == (8, n_action)
    assert jnp.allclose(actions, ref, atol=1e-3, rtol=1e-3)

    # Case 2: ragged batch (exercises the partial-last-block path; grid >= 2).
    x2 = jax.random.normal(k_x2, (200, input_dim), dtype=jnp.float32)
    actions2 = jax.block_until_ready(simple_network_forward(x2, *params))
    ref2 = _reference(x2, w1, b1, w2, b2)
    assert actions2.shape == (200, n_action)
    assert jnp.allclose(actions2, ref2, atol=1e-3, rtol=1e-3)

    print("KERNEL_OK")
</pallas_src>

<mosaic_0001>
module attributes {stable_mosaic.version = 11 : i64} {
  func.func @_mlp_kernel(%arg0: i32, %arg1: memref<8x32xf32, #tpu.memory_space<vmem>>, %arg2: memref<32x128xbf16, #tpu.memory_space<vmem>>, %arg3: memref<1x128xf32, #tpu.memory_space<vmem>>, %arg4: memref<128x16xbf16, #tpu.memory_space<vmem>>, %arg5: memref<1x16xf32, #tpu.memory_space<vmem>>, %arg6: memref<8x16xf32, #tpu.memory_space<vmem>>) attributes {dimension_semantics = [#tpu.dimension_semantics<parallel>], iteration_bounds = array<i64: 1>, scalar_prefetch = 0 : i64, scratch_operands = 0 : i64, tpu.core_type = #tpu.core_type<tc>, window_params = [{transform_indices = @transform_0, window_bounds = array<i64: 8, 32>}, {pipeline_mode = #tpu.pipeline_mode<synchronous>, transform_indices = @transform_1, window_bounds = array<i64: 32, 128>}, {pipeline_mode = #tpu.pipeline_mode<synchronous>, transform_indices = @transform_2, window_bounds = array<i64: 1, 128>}, {pipeline_mode = #tpu.pipeline_mode<synchronous>, transform_indices = @transform_3, window_bounds = array<i64: 128, 16>}, {pipeline_mode = #tpu.pipeline_mode<synchronous>, transform_indices = @transform_4, window_bounds = array<i64: 1, 16>}, {transform_indices = @transform_5, window_bounds = array<i64: 8, 16>}]} {
    %c0 = arith.constant 0 : index
    %c0_0 = arith.constant 0 : index
    %0 = vector.load %arg1[%c0, %c0_0] : memref<8x32xf32, #tpu.memory_space<vmem>>, vector<8x32xf32>
    %1 = arith.truncf %0 : vector<8x32xf32> to vector<8x32xbf16>
    %c0_1 = arith.constant 0 : index
    %c0_2 = arith.constant 0 : index
    %2 = vector.load %arg2[%c0_1, %c0_2] : memref<32x128xbf16, #tpu.memory_space<vmem>>, vector<32x128xbf16>
    %cst = arith.constant dense<0.000000e+00> : vector<8x128xf32>
    %3 = tpu.matmul %1, %2, %cst {dimension_numbers = #tpu.dot_dimension_numbers<[1], [0], [0], [1], [0, 0, 1, 1], [], []>} : vector<8x32xbf16>, vector<32x128xbf16>, vector<8x128xf32> -> vector<8x128xf32>
    %c0_3 = arith.constant 0 : index
    %c0_4 = arith.constant 0 : index
    %4 = vector.load %arg3[%c0_3, %c0_4] : memref<1x128xf32, #tpu.memory_space<vmem>>, vector<1x128xf32>
    %5 = vector.broadcast %4 : vector<1x128xf32> to vector<8x128xf32>
    %6 = arith.addf %3, %5 : vector<8x128xf32>
    %cst_5 = arith.constant 0.000000e+00 : f32
    %7 = vector.broadcast %cst_5 : f32 to vector<8x128xf32>
    %8 = arith.maximumf %6, %7 : vector<8x128xf32>
    %9 = arith.truncf %8 : vector<8x128xf32> to vector<8x128xbf16>
    %c0_6 = arith.constant 0 : index
    %c0_7 = arith.constant 0 : index
    %10 = vector.load %arg4[%c0_6, %c0_7] : memref<128x16xbf16, #tpu.memory_space<vmem>>, vector<128x16xbf16>
    %cst_8 = arith.constant dense<0.000000e+00> : vector<8x16xf32>
    %11 = tpu.matmul %9, %10, %cst_8 {dimension_numbers = #tpu.dot_dimension_numbers<[1], [0], [0], [1], [0, 0, 1, 1], [], []>} : vector<8x128xbf16>, vector<128x16xbf16>, vector<8x16xf32> -> vector<8x16xf32>
    %c0_9 = arith.constant 0 : index
    %c0_10 = arith.constant 0 : index
    %12 = vector.load %arg5[%c0_9, %c0_10] : memref<1x16xf32, #tpu.memory_space<vmem>>, vector<1x16xf32>
    %13 = vector.broadcast %12 : vector<1x16xf32> to vector<8x16xf32>
    %14 = arith.addf %11, %13 : vector<8x16xf32>
    %c0_11 = arith.constant 0 : index
    %c0_12 = arith.constant 0 : index
    %15 = vector.load %arg6[%c0_11, %c0_12] : memref<8x16xf32, #tpu.memory_space<vmem>>, vector<8x16xf32>
    tpu.vector_store %arg6[%c0_11, %c0_12], %14 {strides = array<i32>} : memref<8x16xf32, #tpu.memory_space<vmem>>, vector<8x16xf32>,
    return
  }
  func.func @transform_0(%arg0: i32) -> (i32, i32) {
    %c0_i32 = arith.constant 0 : i32
    %c0_i32_0 = arith.constant 0 : i32
    return %arg0, %c0_i32 : i32, i32
  }
  func.func @transform_1(%arg0: i32) -> (i32, i32) {
    %c0_i32 = arith.constant 0 : i32
    %c0_i32_0 = arith.constant 0 : i32
    %c0_i32_1 = arith.constant 0 : i32
    return %c0_i32, %c0_i32_0 : i32, i32
  }
  func.func @transform_2(%arg0: i32) -> (i32, i32) {
    %c0_i32 = arith.constant 0 : i32
    %c0_i32_0 = arith.constant 0 : i32
    %c0_i32_1 = arith.constant 0 : i32
    return %c0_i32, %c0_i32_0 : i32, i32
  }
  func.func @transform_3(%arg0: i32) -> (i32, i32) {
    %c0_i32 = arith.constant 0 : i32
    %c0_i32_0 = arith.constant 0 : i32
    %c0_i32_1 = arith.constant 0 : i32
    return %c0_i32, %c0_i32_0 : i32, i32
  }
  func.func @transform_4(%arg0: i32) -> (i32, i32) {
    %c0_i32 = arith.constant 0 : i32
    %c0_i32_0 = arith.constant 0 : i32
    %c0_i32_1 = arith.constant 0 : i32
    return %c0_i32, %c0_i32_0 : i32, i32
  }
  func.func @transform_5(%arg0: i32) -> (i32, i32) {
    %c0_i32 = arith.constant 0 : i32
    %c0_i32_0 = arith.constant 0 : i32
    return %arg0, %c0_i32 : i32, i32
  }
}

</mosaic_0001>

<bundles_post_ra>
// kernel: simple_network_forward.1
= control target key start
LH: loop header
LB: loop body
LE: loop exit
PB: predicated region body
PF: predicated region fallthrough
CT: control target
= control target key end

     0   :  { %v310_v1 = vmov 0.0   ;;  %vm311_vm0 = vmmov 0   ;;  %vm47_vm1 = vcmask 261120   ;;  %s394_s0 = inlined_call_operand.vmem [shape: f32[8,32], index: 0, kind: input, shape index: {}]   ;;  %s395_s1 = inlined_call_operand.vmem [shape: bf16[32,128], index: 1, kind: input, shape index: {}]   ;;  %s396_s2 = inlined_call_operand.vmem [shape: f32[1,128], index: 2, kind: input, shape index: {}]   ;;  %s397_s3 = inlined_call_operand.vmem [shape: bf16[128,16], index: 3, kind: input, shape index: {}]   ;;  %s398_s4 = inlined_call_operand.vmem [shape: f32[1,16], index: 4, kind: input, shape index: {}]   ;;  %s399_s5 = inlined_call_operand.hbm [shape: f32[8,16], index: 5, kind: output, shape index: {}]  }
   0x1   :  { %v276_v0 = vld [vmem:[%s395_s1] sm:$0xff]   ;;  %245 = vmatprep.subr.bf16.mxu0 %v310_v1  ;;  %v277_v2 = vld [vmem:[%s395_s1 + $0x8] sm:$0xff]   ;;  %253 = vmatprep.subr.bf16.mxu1 %v310_v1  ;;  %v280_v7 = vld [vmem:[%s397_s3 + $0x10] sm:$0xff]  }
   0x2   :  { %246 = vmatpush3.bf16.msra.mxu0 %v276_v0  ;;  %249 = vmatprep.mubr.msk.bf16.mxu0 %vm311_vm0, %v310_v1  ;;  %v22_v3 = vld [vmem:[%s394_s0] sm:$0xff]  ;;  %v279_v6 = vld [vmem:[%s397_s3 + $0x8] sm:$0xff]  }
   0x3   :  { %247 = vmatprep.subr.bf16.mxu0 %v310_v1  ;;  %v278_v4 = vld [vmem:[%s397_s3] sm:$0xff]   ;;  %269 = vmatprep.mubr.msk.bf16.mxu1 %vm311_vm0, %v310_v1  ;;  %v23_v5 = vpack.c.bf16 %v22_v3, %v22_v3 }
   0x4   :  { %254 = vmatpush3.bf16.msra.mxu1 %v278_v4 }
   0x5   :  { %255 = vmatprep.subr.bf16.mxu1 %v310_v1 }
   0x6   :  { %248 = vmatpush3.bf16.msra.mxu0 %v277_v2 }
   0x8   :  { %256 = vmatpush3.bf16.msra.mxu1 %v279_v6 }
   0x9   :  { %250 = vmatmul.mubr.msk.bf16.vlgmr.msra.gmra.mrb[0].mxu0 %vm47_vm1, %v23_v5  ;;  %257 = vmatprep.subr.bf16.mxu1 %v310_v1 }
   0xa   :  { %10 = vsyncpa [#allocation3], 0  ;;  %v281_v8 = vld [vmem:[%s397_s3 + $0x18] sm:$0xff]   ;;  %v282_v9 = vld [vmem:[%s397_s3 + $0x20] sm:$0xff]   ;;  %s312_s17 = smov [#allocation2]   ;;  %vm204_vm2 = vcmask 130048  }
   0xb   :  { %v283_v10 = vld [vmem:[%s397_s3 + $0x28] sm:$0xff]   ;;  %v284_v11 = vld [vmem:[%s397_s3 + $0x30] sm:$0xff]   ;;  %v285_v12 = vld [vmem:[%s397_s3 + $0x38] sm:$0xff]   ;;  %s212_s18 = sshll.u32 %s312_s17, 4  ;;  %s213_s18 = int_to_ptr.vmem [resolvable:$true] %s212_s18 }
   0xc   :  { %258 = vmatpush3.bf16.msra.mxu1 %v280_v7  ;;  %v220_v13 = vld [vmem:[%s396_s2] ss:$0 sm:$0xff]  ;;  %s286_s2 = scalar_lea.vmem %s213_s18, 128  ;;  %p291_p1 = scmp.lt.s32.totalorder %s213_s18, %s213_s18 }
   0xd   :  { %259 = vmatprep.subr.bf16.mxu1 %v310_v1  ;;  %v224_v21 = vld [vmem:[%s398_s4] ss:$0 sm:$0xff]  ;;  %p287_p0 = scmp.ne.s32.totalorder %s213_s18, %s286_s2  ;;  %p292_p2 = scmp.lt.s32.totalorder %s286_s2, %s286_s2 }
   0xf   :  { %p293_p3 = por %p292_p2, %p291_p1 }
  0x10   :  { %260 = vmatpush3.bf16.msra.mxu1 %v281_v8 }
  0x11   :  { %261 = vmatprep.subr.bf16.mxu1 %v310_v1  ;;  %p294_p4 = pnand %p293_p3, %p287_p0 }
  0x14   :  { %262 = vmatpush3.bf16.msra.mxu1 %v282_v9 }
  0x15   :  { %263 = vmatprep.subr.bf16.mxu1 %v310_v1 }
  0x18   :  { %264 = vmatpush3.bf16.msra.mxu1 %v283_v10 }
  0x19   :  { %265 = vmatprep.subr.bf16.mxu1 %v310_v1 }
  0x1c   :  { %266 = vmatpush3.bf16.msra.mxu1 %v284_v11 }
  0x1d   :  { %267 = vmatprep.subr.bf16.mxu1 %v310_v1 }
  0x20   :  { %268 = vmatpush3.bf16.msra.mxu1 %v285_v12 }
  0xdc   :  { %v85_v14 = vpop.f32.mrb[0].mxu0 }
  0xdd   :  { %v86_v15 = vadd.f32 %v220_v13, %v85_v14  ;;  %v251_v16 = vpop.f32.mrb[1].mxu0 }
  0xde   :  { %v88_v17 = vpop.f32.mrb[2].mxu0 }
  0xdf   :  { %v91_v18 = vmax.f32 %v86_v15, 0.0  ;;  %v252_v19 = vpop.f32.mrb[3].mxu0 }
  0xe1   :  { %v92_v20 = vpack.c.bf16 %v91_v18, %v91_v18 }
  0xe3   :  { %270 = vmatmul.mubr.bf16.vlgmr.msra.gmra.mrb[0].mxu1 %v92_v20 }
 0x1b6   :  { %v198_v22 = vpop.f32.mrb[0].mxu1 }
 0x1b7   :  { %v199_v23 = vadd.f32 %v224_v21, %v198_v22  ;;  %v271_v24 = vpop.f32.mrb[1].mxu1 }
 0x1b8   :  { %v201_v25 = vpop.f32.mrb[2].mxu1 }
 0x1b9   :  { %v272_v26 = vpop.f32.mrb[3].mxu1  ;;  %205 = vst.msk [vmem:[#allocation2] sm:$0xff] %vm204_vm2, %v199_v23 }
 0x1ba   :  { %297 = shalt.err (!%p294_p4)
}
 0x1bb   :  { %s298_s4 = scalar_lea.hbm %s399_s5, 128 }
 0x1bc   :  { %p299_p5 = scmp.ne.s32.totalorder %s399_s5, %s298_s4  ;;  %p302_p6 = scmp.lt.u32.totalorder %s298_s4, %s399_s5 }
 0x1be   :  { %p304_p7 = pnand %p302_p6, %p299_p5 }
 0x1c0   :  { %307 = shalt.err (!%p304_p7)
}
 0x1c1   :  { %215 = dma.vmem_to_hbm [thread:$0]  %s213_s18, 128, %s399_s5, [#allocation3]  }
 0x1c2   :  { %308 = dma.done.wait [#allocation3], 128  }
 0x1c3   :  { %309 = vsyncadd [#allocation3], 4294967168 }
 0x1c4   :  { %219 = vsyncpa [#allocation3], 1 }

</bundles_post_ra>
